<compile_context>
chip_gen: v7x
topology: tpu7x:2x2x1
jax: 0.10.0
libtpu: 0.0.40
codegen_flags: <defaults>
</compile_context>

<pallas_src>
import numpy as np
import jax
import jax.numpy as jnp
from jax.experimental import pallas as pl
from jax.experimental.pallas import tpu as pltpu

ENC_DIMS = [19, 30, 40, 30, 30, 40]   # 5 Linear layers, Tanh between all but the last
DEC_DIMS = [59, 40, 30, 20, 20, 6]    # 5 Linear layers, Tanh between all but the last
Z_DIM = ENC_DIMS[-1]                  # 40
STATE_DIM = DEC_DIMS[0] - Z_DIM       # 19
ACTION_DIM = DEC_DIMS[-1]             # 6
LANE = 128                            # every feature dim is zero-padded to this
N_W = 10                              # 5 encoder + 5 decoder weight slots
N_B = 10                              # 5 encoder + 5 decoder bias slots


# ---------------------------------------------------------------------------
# Kernel
# ---------------------------------------------------------------------------
def cae_loss_kernel(hist_ref, statez_ref, action_ref, lw_ref, w_ref, b_ref, out_ref):
    f32 = jnp.float32
    bf16 = jnp.bfloat16

    # ---- encoder: 5 uniform (TB,128)@(128,128) dots --------------------------
    x = hist_ref[...]                                   # (TB, 128) f32, real lanes 0..18
    for li in range(5):
        x = jnp.dot(x.astype(bf16), w_ref[li],
                    preferred_element_type=f32) + b_ref[li]
        if li < 4:
            x = jnp.tanh(x)
    # z = x: real lanes 0..39, lanes 40..127 exactly zero.

    # ---- decoder: concat(z, state) == z + state-placed-at-lanes-40..58 -------
    y = x + statez_ref[...]                             # (TB, 128)
    for li in range(5):
        y = jnp.dot(y.astype(bf16), w_ref[5 + li],
                    preferred_element_type=f32) + b_ref[5 + li]
        if li < 4:
            y = jnp.tanh(y)
    # y: real lanes 0..5 (decoded action), padded lanes zero.

    # ---- loss partial: weighted squared error, reduced over the batch axis ---
    sq = (y - action_ref[...]) ** 2                     # (TB, 128)
    out_ref[...] = jnp.sum(lw_ref[...] * sq, axis=0, keepdims=True)   # (1, 128)


# ---------------------------------------------------------------------------
# Parameter init / packing
# ---------------------------------------------------------------------------
def _linear_init(key, fan_in, fan_out):
    """PyTorch-style uniform(-1/sqrt(fan_in), 1/sqrt(fan_in)); weight stored (in, out)."""
    kw, kb = jax.random.split(key)
    bound = 1.0 / jnp.sqrt(jnp.float32(fan_in))
    w = jax.random.uniform(kw, (fan_in, fan_out), jnp.float32, -bound, bound)
    b = jax.random.uniform(kb, (fan_out,), jnp.float32, -bound, bound)
    return w, b


def init_cae_params(key):
    keys = jax.random.split(key, 10)
    enc = [_linear_init(keys[i], ENC_DIMS[i], ENC_DIMS[i + 1]) for i in range(5)]
    dec = [_linear_init(keys[5 + i], DEC_DIMS[i], DEC_DIMS[i + 1]) for i in range(5)]
    return enc, dec


def _pad_w(w):
    r, c = w.shape
    return jnp.pad(w, ((0, LANE - r), (0, LANE - c)))


def _pad_b(b):
    b = b.reshape(1, -1)
    return jnp.pad(b, ((0, 0), (0, LANE - b.shape[1])))


def pack_cae_params(enc_params, dec_params):
    """Pack 20 small tensors into one bf16 weight slab + one f32 bias slab (done once).

    Weight slot layout (each stored [in, out], zero-padded to 128x128):
      0..4 : encoder W0..W4
      5    : decoder W0  (the full (59,40) weight; rows 0..39 = z, rows 40..58 = state)
      6..9 : decoder W1..W4
    """
    ws = [p[0] for p in enc_params] + [p[0] for p in dec_params]
    bs = [p[1] for p in enc_params] + [p[1] for p in dec_params]
    w_slab = jnp.stack([_pad_w(w) for w in ws]).astype(jnp.bfloat16)   # (10, 128, 128)
    b_slab = jnp.stack([_pad_b(b) for b in bs])                        # (10,   1, 128) f32
    return w_slab, b_slab


# ---------------------------------------------------------------------------
# Forward wrapper
# ---------------------------------------------------------------------------
@jax.jit
def cae_forward(history, state, action, w_slab, b_slab):
    f32 = jnp.float32
    B = history.shape[0]

    # Batch tiling: weights stay VMEM-resident, activations stream per tile.
    if B <= 256:
        tile_b = B
    else:
        # TODO(synk): support ragged batch via padding + per-row mask in the loss weights.
        assert B % 256 == 0, "large batches must be a multiple of 256"
        tile_b = 256
    num_tiles = B // tile_b

    # Lane-pad inputs once in the wrapper (trivial XLA pads, keeps the kernel slice-free).
    hist_p = jnp.zeros((B, LANE), f32).at[:, :ENC_DIMS[0]].set(history)
    statez_p = jnp.zeros((B, LANE), f32).at[:, Z_DIM:Z_DIM + STATE_DIM].set(state)
    action_p = jnp.zeros((B, LANE), f32).at[:, :ACTION_DIM].set(action)

    # Fused loss column weights: MSE(dec[:,:3],act[:,:3]) + 0.9*MSE(dec[:,3:],act[:,3:]).
    lw_np = np.zeros((1, LANE), np.float32)
    lw_np[0, :3] = 1.0 / (3 * B)
    lw_np[0, 3:ACTION_DIM] = 0.9 / ((ACTION_DIM - 3) * B)
    lw = jnp.asarray(lw_np)

    partials = pl.pallas_call(
        cae_loss_kernel,
        out_shape=jax.ShapeDtypeStruct((num_tiles, LANE), f32),
        grid=(num_tiles,),
        in_specs=[
            pl.BlockSpec((tile_b, LANE), lambda i: (i, 0)),        # history (padded)
            pl.BlockSpec((tile_b, LANE), lambda i: (i, 0)),        # state at lanes 40..58
            pl.BlockSpec((tile_b, LANE), lambda i: (i, 0)),        # action (padded)
            pl.BlockSpec((1, LANE), lambda i: (0, 0)),             # loss weights (resident)
            pl.BlockSpec((N_W, LANE, LANE), lambda i: (0, 0, 0)),  # weight slab (resident)
            pl.BlockSpec((N_B, 1, LANE), lambda i: (0, 0, 0)),     # bias slab (resident)
        ],
        out_specs=pl.BlockSpec((1, LANE), lambda i: (i, 0)),       # lane-dense partial sums
        compiler_params=pltpu.CompilerParams(dimension_semantics=("parallel",)),
    )(hist_p, statez_p, action_p, lw, w_slab, b_slab)

    return jnp.sum(partials)


# ---------------------------------------------------------------------------
# Pure-JAX reference (full f32, mirrors the PyTorch module)
# ---------------------------------------------------------------------------
def cae_forward_ref(history, state, action, enc_params, dec_params):
    x = history
    for i, (w, b) in enumerate(enc_params):
        x = x @ w + b
        if i < 4:
            x = jnp.tanh(x)
    z = x
    y = jnp.concatenate([z, state], axis=1)
    for i, (w, b) in enumerate(dec_params):
        y = y @ w + b
        if i < 4:
            y = jnp.tanh(y)
    sq = (y - action) ** 2
    return jnp.mean(sq[:, :3]) + 0.9 * jnp.mean(sq[:, 3:])


if __name__ == "__main__":
    key = jax.random.PRNGKey(0)
    k_param, k_h, k_s, k_a = jax.random.split(key, 4)

    B = 8
    history = jax.random.normal(k_h, (B, ENC_DIMS[0]), jnp.float32)   # (8, 19)
    state = jax.random.normal(k_s, (B, STATE_DIM), jnp.float32)       # (8, 19)
    action = jax.random.normal(k_a, (B, ACTION_DIM), jnp.float32)     # (8, 6)

    enc_params, dec_params = init_cae_params(k_param)
    w_slab, b_slab = pack_cae_params(enc_params, dec_params)
    w_slab, b_slab = jax.block_until_ready((w_slab, b_slab))

    loss = cae_forward(history, state, action, w_slab, b_slab)
    loss = jax.block_until_ready(loss)

    ref = cae_forward_ref(history, state, action, enc_params, dec_params)
    ref = jax.block_until_ready(ref)

    # bf16 weight slab / bf16 dot inputs: looser tolerance vs. the f32 reference.
    assert jnp.allclose(loss, ref, rtol=5e-2, atol=5e-3), (float(loss), float(ref))

    print("KERNEL_OK")
</pallas_src>

<mosaic_0001>
module attributes {stable_mosaic.version = 11 : i64} {
  func.func @cae_loss_kernel(%arg0: i32, %arg1: memref<8x128xf32, #tpu.memory_space<vmem>>, %arg2: memref<8x128xf32, #tpu.memory_space<vmem>>, %arg3: memref<8x128xf32, #tpu.memory_space<vmem>>, %arg4: memref<1x128xf32, #tpu.memory_space<vmem>>, %arg5: memref<10x128x128xbf16, #tpu.memory_space<vmem>>, %arg6: memref<10x1x128xf32, #tpu.memory_space<vmem>>, %arg7: memref<1x128xf32, #tpu.memory_space<vmem>>) attributes {dimension_semantics = [#tpu.dimension_semantics<parallel>], iteration_bounds = array<i64: 1>, scalar_prefetch = 0 : i64, scratch_operands = 0 : i64, tpu.core_type = #tpu.core_type<tc>, window_params = [{transform_indices = @transform_0, window_bounds = array<i64: 8, 128>}, {transform_indices = @transform_1, window_bounds = array<i64: 8, 128>}, {transform_indices = @transform_2, window_bounds = array<i64: 8, 128>}, {pipeline_mode = #tpu.pipeline_mode<synchronous>, transform_indices = @transform_3, window_bounds = array<i64: 1, 128>}, {pipeline_mode = #tpu.pipeline_mode<synchronous>, transform_indices = @transform_4, window_bounds = array<i64: 10, 128, 128>}, {pipeline_mode = #tpu.pipeline_mode<synchronous>, transform_indices = @transform_5, window_bounds = array<i64: 10, 1, 128>}, {transform_indices = @transform_6, window_bounds = array<i64: 1, 128>}]} {
    %c0 = arith.constant 0 : index
    %c0_0 = arith.constant 0 : index
    %0 = vector.load %arg1[%c0, %c0_0] : memref<8x128xf32, #tpu.memory_space<vmem>>, vector<8x128xf32>
    %1 = arith.truncf %0 : vector<8x128xf32> to vector<8x128xbf16>
    %c0_1 = arith.constant 0 : index
    %c0_2 = arith.constant 0 : index
    %c0_3 = arith.constant 0 : index
    %2 = vector.load %arg5[%c0_1, %c0_2, %c0_3] : memref<10x128x128xbf16, #tpu.memory_space<vmem>>, vector<1x128x128xbf16>
    %3 = vector.shape_cast %2 : vector<1x128x128xbf16> to vector<128x128xbf16>
    %cst = arith.constant dense<0.000000e+00> : vector<8x128xf32>
    %4 = tpu.matmul %1, %3, %cst {dimension_numbers = #tpu.dot_dimension_numbers<[1], [0], [0], [1], [0, 0, 1, 1], [], []>} : vector<8x128xbf16>, vector<128x128xbf16>, vector<8x128xf32> -> vector<8x128xf32>
    %c0_4 = arith.constant 0 : index
    %c0_5 = arith.constant 0 : index
    %c0_6 = arith.constant 0 : index
    %5 = vector.load %arg6[%c0_4, %c0_5, %c0_6] : memref<10x1x128xf32, #tpu.memory_space<vmem>>, vector<1x1x128xf32>
    %6 = vector.shape_cast %5 : vector<1x1x128xf32> to vector<1x128xf32>
    %7 = vector.broadcast %6 : vector<1x128xf32> to vector<8x128xf32>
    %8 = arith.addf %4, %7 : vector<8x128xf32>
    %9 = math.tanh %8 : vector<8x128xf32>
    %10 = arith.truncf %9 : vector<8x128xf32> to vector<8x128xbf16>
    %c1 = arith.constant 1 : index
    %c0_7 = arith.constant 0 : index
    %c0_8 = arith.constant 0 : index
    %11 = vector.load %arg5[%c1, %c0_7, %c0_8] : memref<10x128x128xbf16, #tpu.memory_space<vmem>>, vector<1x128x128xbf16>
    %12 = vector.shape_cast %11 : vector<1x128x128xbf16> to vector<128x128xbf16>
    %cst_9 = arith.constant dense<0.000000e+00> : vector<8x128xf32>
    %13 = tpu.matmul %10, %12, %cst_9 {dimension_numbers = #tpu.dot_dimension_numbers<[1], [0], [0], [1], [0, 0, 1, 1], [], []>} : vector<8x128xbf16>, vector<128x128xbf16>, vector<8x128xf32> -> vector<8x128xf32>
    %c1_10 = arith.constant 1 : index
    %c0_11 = arith.constant 0 : index
    %c0_12 = arith.constant 0 : index
    %14 = vector.load %arg6[%c1_10, %c0_11, %c0_12] : memref<10x1x128xf32, #tpu.memory_space<vmem>>, vector<1x1x128xf32>
    %15 = vector.shape_cast %14 : vector<1x1x128xf32> to vector<1x128xf32>
    %16 = vector.broadcast %15 : vector<1x128xf32> to vector<8x128xf32>
    %17 = arith.addf %13, %16 : vector<8x128xf32>
    %18 = math.tanh %17 : vector<8x128xf32>
    %19 = arith.truncf %18 : vector<8x128xf32> to vector<8x128xbf16>
    %c2 = arith.constant 2 : index
    %c0_13 = arith.constant 0 : index
    %c0_14 = arith.constant 0 : index
    %20 = vector.load %arg5[%c2, %c0_13, %c0_14] : memref<10x128x128xbf16, #tpu.memory_space<vmem>>, vector<1x128x128xbf16>
    %21 = vector.shape_cast %20 : vector<1x128x128xbf16> to vector<128x128xbf16>
    %cst_15 = arith.constant dense<0.000000e+00> : vector<8x128xf32>
    %22 = tpu.matmul %19, %21, %cst_15 {dimension_numbers = #tpu.dot_dimension_numbers<[1], [0], [0], [1], [0, 0, 1, 1], [], []>} : vector<8x128xbf16>, vector<128x128xbf16>, vector<8x128xf32> -> vector<8x128xf32>
    %c2_16 = arith.constant 2 : index
    %c0_17 = arith.constant 0 : index
    %c0_18 = arith.constant 0 : index
    %23 = vector.load %arg6[%c2_16, %c0_17, %c0_18] : memref<10x1x128xf32, #tpu.memory_space<vmem>>, vector<1x1x128xf32>
    %24 = vector.shape_cast %23 : vector<1x1x128xf32> to vector<1x128xf32>
    %25 = vector.broadcast %24 : vector<1x128xf32> to vector<8x128xf32>
    %26 = arith.addf %22, %25 : vector<8x128xf32>
    %27 = math.tanh %26 : vector<8x128xf32>
    %28 = arith.truncf %27 : vector<8x128xf32> to vector<8x128xbf16>
    %c3 = arith.constant 3 : index
    %c0_19 = arith.constant 0 : index
    %c0_20 = arith.constant 0 : index
    %29 = vector.load %arg5[%c3, %c0_19, %c0_20] : memref<10x128x128xbf16, #tpu.memory_space<vmem>>, vector<1x128x128xbf16>
    %30 = vector.shape_cast %29 : vector<1x128x128xbf16> to vector<128x128xbf16>
    %cst_21 = arith.constant dense<0.000000e+00> : vector<8x128xf32>
    %31 = tpu.matmul %28, %30, %cst_21 {dimension_numbers = #tpu.dot_dimension_numbers<[1], [0], [0], [1], [0, 0, 1, 1], [], []>} : vector<8x128xbf16>, vector<128x128xbf16>, vector<8x128xf32> -> vector<8x128xf32>
    %c3_22 = arith.constant 3 : index
    %c0_23 = arith.constant 0 : index
    %c0_24 = arith.constant 0 : index
    %32 = vector.load %arg6[%c3_22, %c0_23, %c0_24] : memref<10x1x128xf32, #tpu.memory_space<vmem>>, vector<1x1x128xf32>
    %33 = vector.shape_cast %32 : vector<1x1x128xf32> to vector<1x128xf32>
    %34 = vector.broadcast %33 : vector<1x128xf32> to vector<8x128xf32>
    %35 = arith.addf %31, %34 : vector<8x128xf32>
    %36 = math.tanh %35 : vector<8x128xf32>
    %37 = arith.truncf %36 : vector<8x128xf32> to vector<8x128xbf16>
    %c4 = arith.constant 4 : index
    %c0_25 = arith.constant 0 : index
    %c0_26 = arith.constant 0 : index
    %38 = vector.load %arg5[%c4, %c0_25, %c0_26] : memref<10x128x128xbf16, #tpu.memory_space<vmem>>, vector<1x128x128xbf16>
    %39 = vector.shape_cast %38 : vector<1x128x128xbf16> to vector<128x128xbf16>
    %cst_27 = arith.constant dense<0.000000e+00> : vector<8x128xf32>
    %40 = tpu.matmul %37, %39, %cst_27 {dimension_numbers = #tpu.dot_dimension_numbers<[1], [0], [0], [1], [0, 0, 1, 1], [], []>} : vector<8x128xbf16>, vector<128x128xbf16>, vector<8x128xf32> -> vector<8x128xf32>
    %c4_28 = arith.constant 4 : index
    %c0_29 = arith.constant 0 : index
    %c0_30 = arith.constant 0 : index
    %41 = vector.load %arg6[%c4_28, %c0_29, %c0_30] : memref<10x1x128xf32, #tpu.memory_space<vmem>>, vector<1x1x128xf32>
    %42 = vector.shape_cast %41 : vector<1x1x128xf32> to vector<1x128xf32>
    %43 = vector.broadcast %42 : vector<1x128xf32> to vector<8x128xf32>
    %44 = arith.addf %40, %43 : vector<8x128xf32>
    %c0_31 = arith.constant 0 : index
    %c0_32 = arith.constant 0 : index
    %45 = vector.load %arg2[%c0_31, %c0_32] : memref<8x128xf32, #tpu.memory_space<vmem>>, vector<8x128xf32>
    %46 = arith.addf %44, %45 : vector<8x128xf32>
    %47 = arith.truncf %46 : vector<8x128xf32> to vector<8x128xbf16>
    %c5 = arith.constant 5 : index
    %c0_33 = arith.constant 0 : index
    %c0_34 = arith.constant 0 : index
    %48 = vector.load %arg5[%c5, %c0_33, %c0_34] : memref<10x128x128xbf16, #tpu.memory_space<vmem>>, vector<1x128x128xbf16>
    %49 = vector.shape_cast %48 : vector<1x128x128xbf16> to vector<128x128xbf16>
    %cst_35 = arith.constant dense<0.000000e+00> : vector<8x128xf32>
    %50 = tpu.matmul %47, %49, %cst_35 {dimension_numbers = #tpu.dot_dimension_numbers<[1], [0], [0], [1], [0, 0, 1, 1], [], []>} : vector<8x128xbf16>, vector<128x128xbf16>, vector<8x128xf32> -> vector<8x128xf32>
    %c5_36 = arith.constant 5 : index
    %c0_37 = arith.constant 0 : index
    %c0_38 = arith.constant 0 : index
    %51 = vector.load %arg6[%c5_36, %c0_37, %c0_38] : memref<10x1x128xf32, #tpu.memory_space<vmem>>, vector<1x1x128xf32>
    %52 = vector.shape_cast %51 : vector<1x1x128xf32> to vector<1x128xf32>
    %53 = vector.broadcast %52 : vector<1x128xf32> to vector<8x128xf32>
    %54 = arith.addf %50, %53 : vector<8x128xf32>
    %55 = math.tanh %54 : vector<8x128xf32>
    %56 = arith.truncf %55 : vector<8x128xf32> to vector<8x128xbf16>
    %c6 = arith.constant 6 : index
    %c0_39 = arith.constant 0 : index
    %c0_40 = arith.constant 0 : index
    %57 = vector.load %arg5[%c6, %c0_39, %c0_40] : memref<10x128x128xbf16, #tpu.memory_space<vmem>>, vector<1x128x128xbf16>
    %58 = vector.shape_cast %57 : vector<1x128x128xbf16> to vector<128x128xbf16>
    %cst_41 = arith.constant dense<0.000000e+00> : vector<8x128xf32>
    %59 = tpu.matmul %56, %58, %cst_41 {dimension_numbers = #tpu.dot_dimension_numbers<[1], [0], [0], [1], [0, 0, 1, 1], [], []>} : vector<8x128xbf16>, vector<128x128xbf16>, vector<8x128xf32> -> vector<8x128xf32>
    %c6_42 = arith.constant 6 : index
    %c0_43 = arith.constant 0 : index
    %c0_44 = arith.constant 0 : index
    %60 = vector.load %arg6[%c6_42, %c0_43, %c0_44] : memref<10x1x128xf32, #tpu.memory_space<vmem>>, vector<1x1x128xf32>
    %61 = vector.shape_cast %60 : vector<1x1x128xf32> to vector<1x128xf32>
    %62 = vector.broadcast %61 : vector<1x128xf32> to vector<8x128xf32>
    %63 = arith.addf %59, %62 : vector<8x128xf32>
    %64 = math.tanh %63 : vector<8x128xf32>
    %65 = arith.truncf %64 : vector<8x128xf32> to vector<8x128xbf16>
    %c7 = arith.constant 7 : index
    %c0_45 = arith.constant 0 : index
    %c0_46 = arith.constant 0 : index
    %66 = vector.load %arg5[%c7, %c0_45, %c0_46] : memref<10x128x128xbf16, #tpu.memory_space<vmem>>, vector<1x128x128xbf16>
    %67 = vector.shape_cast %66 : vector<1x128x128xbf16> to vector<128x128xbf16>
    %cst_47 = arith.constant dense<0.000000e+00> : vector<8x128xf32>
    %68 = tpu.matmul %65, %67, %cst_47 {dimension_numbers = #tpu.dot_dimension_numbers<[1], [0], [0], [1], [0, 0, 1, 1], [], []>} : vector<8x128xbf16>, vector<128x128xbf16>, vector<8x128xf32> -> vector<8x128xf32>
    %c7_48 = arith.constant 7 : index
    %c0_49 = arith.constant 0 : index
    %c0_50 = arith.constant 0 : index
    %69 = vector.load %arg6[%c7_48, %c0_49, %c0_50] : memref<10x1x128xf32, #tpu.memory_space<vmem>>, vector<1x1x128xf32>
    %70 = vector.shape_cast %69 : vector<1x1x128xf32> to vector<1x128xf32>
    %71 = vector.broadcast %70 : vector<1x128xf32> to vector<8x128xf32>
    %72 = arith.addf %68, %71 : vector<8x128xf32>
    %73 = math.tanh %72 : vector<8x128xf32>
    %74 = arith.truncf %73 : vector<8x128xf32> to vector<8x128xbf16>
    %c8 = arith.constant 8 : index
    %c0_51 = arith.constant 0 : index
    %c0_52 = arith.constant 0 : index
    %75 = vector.load %arg5[%c8, %c0_51, %c0_52] : memref<10x128x128xbf16, #tpu.memory_space<vmem>>, vector<1x128x128xbf16>
    %76 = vector.shape_cast %75 : vector<1x128x128xbf16> to vector<128x128xbf16>
    %cst_53 = arith.constant dense<0.000000e+00> : vector<8x128xf32>
    %77 = tpu.matmul %74, %76, %cst_53 {dimension_numbers = #tpu.dot_dimension_numbers<[1], [0], [0], [1], [0, 0, 1, 1], [], []>} : vector<8x128xbf16>, vector<128x128xbf16>, vector<8x128xf32> -> vector<8x128xf32>
    %c8_54 = arith.constant 8 : index
    %c0_55 = arith.constant 0 : index
    %c0_56 = arith.constant 0 : index
    %78 = vector.load %arg6[%c8_54, %c0_55, %c0_56] : memref<10x1x128xf32, #tpu.memory_space<vmem>>, vector<1x1x128xf32>
    %79 = vector.shape_cast %78 : vector<1x1x128xf32> to vector<1x128xf32>
    %80 = vector.broadcast %79 : vector<1x128xf32> to vector<8x128xf32>
    %81 = arith.addf %77, %80 : vector<8x128xf32>
    %82 = math.tanh %81 : vector<8x128xf32>
    %83 = arith.truncf %82 : vector<8x128xf32> to vector<8x128xbf16>
    %c9 = arith.constant 9 : index
    %c0_57 = arith.constant 0 : index
    %c0_58 = arith.constant 0 : index
    %84 = vector.load %arg5[%c9, %c0_57, %c0_58] : memref<10x128x128xbf16, #tpu.memory_space<vmem>>, vector<1x128x128xbf16>
    %85 = vector.shape_cast %84 : vector<1x128x128xbf16> to vector<128x128xbf16>
    %cst_59 = arith.constant dense<0.000000e+00> : vector<8x128xf32>
    %86 = tpu.matmul %83, %85, %cst_59 {dimension_numbers = #tpu.dot_dimension_numbers<[1], [0], [0], [1], [0, 0, 1, 1], [], []>} : vector<8x128xbf16>, vector<128x128xbf16>, vector<8x128xf32> -> vector<8x128xf32>
    %c9_60 = arith.constant 9 : index
    %c0_61 = arith.constant 0 : index
    %c0_62 = arith.constant 0 : index
    %87 = vector.load %arg6[%c9_60, %c0_61, %c0_62] : memref<10x1x128xf32, #tpu.memory_space<vmem>>, vector<1x1x128xf32>
    %88 = vector.shape_cast %87 : vector<1x1x128xf32> to vector<1x128xf32>
    %89 = vector.broadcast %88 : vector<1x128xf32> to vector<8x128xf32>
    %90 = arith.addf %86, %89 : vector<8x128xf32>
    %c0_63 = arith.constant 0 : index
    %c0_64 = arith.constant 0 : index
    %91 = vector.load %arg3[%c0_63, %c0_64] : memref<8x128xf32, #tpu.memory_space<vmem>>, vector<8x128xf32>
    %92 = arith.subf %90, %91 : vector<8x128xf32>
    %93 = arith.mulf %92, %92 : vector<8x128xf32>
    %c0_65 = arith.constant 0 : index
    %c0_66 = arith.constant 0 : index
    %94 = vector.load %arg4[%c0_65, %c0_66] : memref<1x128xf32, #tpu.memory_space<vmem>>, vector<1x128xf32>
    %95 = vector.broadcast %94 : vector<1x128xf32> to vector<8x128xf32>
    %96 = arith.mulf %95, %93 : vector<8x128xf32>
    %cst_67 = arith.constant dense<0.000000e+00> : vector<128xf32>
    %97 = vector.multi_reduction <add>, %96, %cst_67 [0] : vector<8x128xf32> to vector<128xf32>
    %98 = vector.shape_cast %97 : vector<128xf32> to vector<1x128xf32>
    %c0_68 = arith.constant 0 : index
    %c0_69 = arith.constant 0 : index
    %99 = vector.load %arg7[%c0_68, %c0_69] : memref<1x128xf32, #tpu.memory_space<vmem>>, vector<1x128xf32>
    tpu.vector_store %arg7[%c0_68, %c0_69], %98 {strides = array<i32>} : memref<1x128xf32, #tpu.memory_space<vmem>>, vector<1x128xf32>,
    return
  }
  func.func @transform_0(%arg0: i32) -> (i32, i32) {
    %c0_i32 = arith.constant 0 : i32
    %c0_i32_0 = arith.constant 0 : i32
    return %arg0, %c0_i32 : i32, i32
  }
  func.func @transform_1(%arg0: i32) -> (i32, i32) {
    %c0_i32 = arith.constant 0 : i32
    %c0_i32_0 = arith.constant 0 : i32
    return %arg0, %c0_i32 : i32, i32
  }
  func.func @transform_2(%arg0: i32) -> (i32, i32) {
    %c0_i32 = arith.constant 0 : i32
    %c0_i32_0 = arith.constant 0 : i32
    return %arg0, %c0_i32 : i32, i32
  }
  func.func @transform_3(%arg0: i32) -> (i32, i32) {
    %c0_i32 = arith.constant 0 : i32
    %c0_i32_0 = arith.constant 0 : i32
    %c0_i32_1 = arith.constant 0 : i32
    return %c0_i32, %c0_i32_0 : i32, i32
  }
  func.func @transform_4(%arg0: i32) -> (i32, i32, i32) {
    %c0_i32 = arith.constant 0 : i32
    %c0_i32_0 = arith.constant 0 : i32
    %c0_i32_1 = arith.constant 0 : i32
    %c0_i32_2 = arith.constant 0 : i32
    return %c0_i32, %c0_i32_0, %c0_i32_1 : i32, i32, i32
  }
  func.func @transform_5(%arg0: i32) -> (i32, i32, i32) {
    %c0_i32 = arith.constant 0 : i32
    %c0_i32_0 = arith.constant 0 : i32
    %c0_i32_1 = arith.constant 0 : i32
    %c0_i32_2 = arith.constant 0 : i32
    return %c0_i32, %c0_i32_0, %c0_i32_1 : i32, i32, i32
  }
  func.func @transform_6(%arg0: i32) -> (i32, i32) {
    %c0_i32 = arith.constant 0 : i32
    %c0_i32_0 = arith.constant 0 : i32
    return %arg0, %c0_i32 : i32, i32
  }
}

</mosaic_0001>

<bundles_post_ra>
// kernel: cae_forward.1
= control target key start
LH: loop header
LB: loop body
LE: loop exit
PB: predicated region body
PF: predicated region fallthrough
CT: control target
= control target key end

     0   :  { %11 = vsyncpa [#allocation3], 0  ;;  %s1725_s21 = smov [#allocation2]   ;;  %s1922_s0 = inlined_call_operand.vmem [shape: f32[8,128], index: 0, kind: input, shape index: {}]   ;;  %s1923_s1 = inlined_call_operand.vmem [shape: f32[8,128], index: 1, kind: input, shape index: {}]   ;;  %s1924_s2 = inlined_call_operand.vmem [shape: f32[8,128], index: 2, kind: input, shape index: {}]   ;;  %s1925_s3 = inlined_call_operand.vmem [shape: f32[1,128], index: 3, kind: input, shape index: {}]   ;;  %s1926_s4 = inlined_call_operand.hbm [shape: bf16[10,128,128], index: 4, kind: input, shape index: {}]   ;;  %s1927_s5 = inlined_call_operand.vmem [shape: f32[10,1,128], index: 5, kind: input, shape index: {}]   ;;  %s1928_s6 = inlined_call_operand.vmem [shape: f32[1,128], index: 6, kind: output, shape index: {}]  }
   0x1   :  { %s25_s22 = sshll.u32 %s1725_s21, 4  ;;  %s1701_s25 = scalar_lea.hbm %s1926_s4, 10240  ;;  %s26_s22 = int_to_ptr.vmem [resolvable:$true] %s25_s22 }
   0x2   :  { %p1702_p0 = scmp.ne.s32.totalorder %s1926_s4, %s1701_s25  ;;  %p1705_p1 = scmp.lt.u32.totalorder %s1701_s25, %s1926_s4 }
   0x4   :  { %p1707_p2 = pnand %p1705_p1, %p1702_p0 }
   0x6   :  { %1710 = shalt.err (!%p1707_p2)
}
   0x7   :  { %s1711_s30 = scalar_lea.vmem %s26_s22, 10240  ;;  %p1716_p4 = scmp.lt.s32.totalorder %s26_s22, %s26_s22 }
   0x8   :  { %p1712_p3 = scmp.ne.s32.totalorder %s26_s22, %s1711_s30  ;;  %p1717_p5 = scmp.lt.s32.totalorder %s1711_s30, %s1711_s30 }
   0xa   :  { %p1718_p6 = por %p1717_p5, %p1716_p4 }
   0xc   :  { %p1719_p7 = pnand %p1718_p6, %p1712_p3 }
   0xe   :  { %1722 = shalt.err (!%p1719_p7)
}
   0xf   :  { %s1726_s7 = smov 64   ;;  %s1727_s8 = smov 4  }
  0x10   :  { %31 = dma.hbm_to_vmem [thread:$0]  %s1926_s4, 10240, %s26_s22, [#allocation3], %s1726_s7, %s1726_s7, %s1727_s8  }
  0x11   :  { %1723 = dma.done.wait [#allocation3], 10240  }
  0x12   :  { %1724 = vsyncadd [#allocation3], 4294957056  ;;  %v1728_v0 = vmov 0.0   ;;  %vm1729_vm0 = vmmov 0   ;;  %v1605_v1 = vld [vmem:[#allocation2] sm:$0xff]   ;;  %v1606_v2 = vld [vmem:[#allocation2 + $0x8] sm:$0xff]  }
  0x13   :  { %1400 = vmatprep.subr.bf16.mxu0 %v1728_v0  ;;  %1416 = vmatprep.mubr.msk.bf16.mxu0 %vm1729_vm0, %v1728_v0  ;;  %v1607_v3 = vld [vmem:[#allocation2 + $0x10] sm:$0xff]   ;;  %v1613_v4 = vld [vmem:[#allocation2 + $0x40] sm:$0xff]   ;;  %v1608_v5 = vld [vmem:[#allocation2 + $0x18] sm:$0xff]  }
  0x14   :  { %1420 = vmatprep.subr.bf16.mxu1 %v1728_v0  ;;  %1436 = vmatprep.mubr.msk.bf16.mxu1 %vm1729_vm0, %v1728_v0  ;;  %v1614_v6 = vld [vmem:[#allocation2 + $0x48] sm:$0xff]   ;;  %v1609_v7 = vld [vmem:[#allocation2 + $0x20] sm:$0xff]   ;;  %v1615_v8 = vld [vmem:[#allocation2 + $0x50] sm:$0xff]  }
  0x15   :  { %1401 = vmatpush3.bf16.msra.mxu0 %v1605_v1  ;;  %1421 = vmatpush3.bf16.msra.mxu1 %v1613_v4  ;;  %v1610_v9 = vld [vmem:[#allocation2 + $0x28] sm:$0xff]   ;;  %v1616_v10 = vld [vmem:[#allocation2 + $0x58] sm:$0xff]   ;;  %v1611_v11 = vld [vmem:[#allocation2 + $0x30] sm:$0xff]  }
  0x16   :  { %1402 = vmatprep.subr.bf16.mxu0 %v1728_v0  ;;  %1422 = vmatprep.subr.bf16.mxu1 %v1728_v0  ;;  %v1612_v12 = vld [vmem:[#allocation2 + $0x38] sm:$0xff]   ;;  %v38_v13 = vld [vmem:[%s1922_s0] sm:$0xff]  ;;  %v1618_v16 = vld [vmem:[#allocation2 + $0x68] sm:$0xff]  }
  0x17   :  { %v39_v14 = vpack.c.bf16 %v38_v13, %v38_v13  ;;  %v1617_v15 = vld [vmem:[#allocation2 + $0x60] sm:$0xff]   ;;  %v1619_v17 = vld [vmem:[#allocation2 + $0x70] sm:$0xff]   ;;  %v1620_v18 = vld [vmem:[#allocation2 + $0x78] sm:$0xff]  }
  0x18   :  { %v1621_v19 = vld [vmem:[#allocation2 + $0x80] sm:$0xff]   ;;  %v1622_v20 = vld [vmem:[#allocation2 + $0x88] sm:$0xff]   ;;  %v1623_v21 = vld [vmem:[#allocation2 + $0x90] sm:$0xff]  }
  0x19   :  { %1403 = vmatpush3.bf16.msra.mxu0 %v1606_v2  ;;  %1423 = vmatpush3.bf16.msra.mxu1 %v1614_v6  ;;  %v1624_v22 = vld [vmem:[#allocation2 + $0x98] sm:$0xff]   ;;  %v1210_v23 = vld [vmem:[%s1927_s5] ss:$0 sm:$0xff]  ;;  %v1626_v32 = vld [vmem:[#allocation2 + $0xa8] sm:$0xff]  }
  0x1a   :  { %1404 = vmatprep.subr.bf16.mxu0 %v1728_v0  ;;  %1424 = vmatprep.subr.bf16.mxu1 %v1728_v0  ;;  %v1625_v31 = vld [vmem:[#allocation2 + $0xa0] sm:$0xff]   ;;  %v1627_v33 = vld [vmem:[#allocation2 + $0xb0] sm:$0xff]   ;;  %v1628_v34 = vld [vmem:[#allocation2 + $0xb8] sm:$0xff]  }
  0x1b   :  { %v1629_v35 = vld [vmem:[#allocation2 + $0xc0] sm:$0xff]   ;;  %v1630_v36 = vld [vmem:[#allocation2 + $0xc8] sm:$0xff]   ;;  %v1631_v37 = vld [vmem:[#allocation2 + $0xd0] sm:$0xff]  }
  0x1c   :  { %v1632_v38 = vld [vmem:[#allocation2 + $0xd8] sm:$0xff]   ;;  %v1220_v39 = vld [vmem:[%s1927_s5 + $0x1] ss:$0 sm:$0xff]  ;;  %v1634_v48 = vld [vmem:[#allocation2 + $0xe8] sm:$0xff]  }
  0x1d   :  { %1405 = vmatpush3.bf16.msra.mxu0 %v1607_v3  ;;  %1425 = vmatpush3.bf16.msra.mxu1 %v1615_v8  ;;  %v1633_v47 = vld [vmem:[#allocation2 + $0xe0] sm:$0xff]   ;;  %v1635_v49 = vld [vmem:[#allocation2 + $0xf0] sm:$0xff]   ;;  %v1636_v50 = vld [vmem:[#allocation2 + $0xf8] sm:$0xff]  }
  0x1e   :  { %1406 = vmatprep.subr.bf16.mxu0 %v1728_v0  ;;  %1426 = vmatprep.subr.bf16.mxu1 %v1728_v0  ;;  %v1637_v51 = vld [vmem:[#allocation2 + $0x100] sm:$0xff]   ;;  %v1638_v52 = vld [vmem:[#allocation2 + $0x108] sm:$0xff]   ;;  %v1639_v53 = vld [vmem:[#allocation2 + $0x110] sm:$0xff]  }
  0x1f   :  { %v1640_v54 = vld [vmem:[#allocation2 + $0x118] sm:$0xff]   ;;  %v1230_v55 = vld [vmem:[%s1927_s5 + $0x2] ss:$0 sm:$0xff]  ;;  %v1642_v1 = vld [vmem:[#allocation2 + $0x128] sm:$0xff]  }
  0x20   :  { %v1641_v63 = vld [vmem:[#allocation2 + $0x120] sm:$0xff]   ;;  %v1643_v2 = vld [vmem:[#allocation2 + $0x130] sm:$0xff]   ;;  %v1644_v3 = vld [vmem:[#allocation2 + $0x138] sm:$0xff]  }
  0x21   :  { %1407 = vmatpush3.bf16.msra.mxu0 %v1608_v5  ;;  %1427 = vmatpush3.bf16.msra.mxu1 %v1616_v10  ;;  %v1645_v4 = vld [vmem:[#allocation2 + $0x140] sm:$0xff]   ;;  %v1646_v5 = vld [vmem:[#allocation2 + $0x148] sm:$0xff]   ;;  %v1647_v6 = vld [vmem:[#allocation2 + $0x150] sm:$0xff]  }
  0x22   :  { %1408 = vmatprep.subr.bf16.mxu0 %v1728_v0  ;;  %1428 = vmatprep.subr.bf16.mxu1 %v1728_v0  ;;  %v1649_v8 = vld [vmem:[#allocation2 + $0x160] sm:$0xff]  }
  0x23   :  { %v1240_v10 = vld [vmem:[%s1927_s5 + $0x3] ss:$0 sm:$0xff] }
  0x25   :  { %1409 = vmatpush3.bf16.msra.mxu0 %v1609_v7  ;;  %1429 = vmatpush3.bf16.msra.mxu1 %v1617_v15  ;;  %v1648_v7 = vld [vmem:[#allocation2 + $0x158] sm:$0xff]  }
  0x26   :  { %1410 = vmatprep.subr.bf16.mxu0 %v1728_v0  ;;  %1430 = vmatprep.subr.bf16.mxu1 %v1728_v0 }
  0x29   :  { %1411 = vmatpush3.bf16.msra.mxu0 %v1610_v9  ;;  %1431 = vmatpush3.bf16.msra.mxu1 %v1618_v16  ;;  %v1650_v9 = vld [vmem:[#allocation2 + $0x168] sm:$0xff]  }
  0x2a   :  { %1412 = vmatprep.subr.bf16.mxu0 %v1728_v0  ;;  %1432 = vmatprep.subr.bf16.mxu1 %v1728_v0 }
  0x2d   :  { %1413 = vmatpush3.bf16.msra.mxu0 %v1611_v11  ;;  %1433 = vmatpush3.bf16.msra.mxu1 %v1619_v17 }
  0x2e   :  { %1414 = vmatprep.subr.bf16.mxu0 %v1728_v0  ;;  %1434 = vmatprep.subr.bf16.mxu1 %v1728_v0 }
  0x31   :  { %1415 = vmatpush3.bf16.msra.mxu0 %v1612_v12  ;;  %1435 = vmatpush3.bf16.msra.mxu1 %v1620_v18  ;;  %v1651_v18 = vld [vmem:[#allocation2 + $0x170] sm:$0xff]  }
  0x32   :  { %1440 = vmatprep.subr.bf16.mxu0 %v1728_v0  ;;  %1460 = vmatprep.subr.bf16.mxu1 %v1728_v0 }
  0x34   :  { %1417 = vmatmul.mubr.bf16.vlgmr.msra.gmra.mrb[0].mxu0 %v39_v14 }
  0x35   :  { %1456 = vmatprep.mubr.msk.bf16.mxu0 %vm1729_vm0, %v1728_v0  ;;  %1441 = vmatpush3.bf16.msra.mxu0 %v1621_v19  ;;  %v1652_v19 = vld [vmem:[#allocation2 + $0x178] sm:$0xff]  }
  0x36   :  { %1442 = vmatprep.subr.bf16.mxu0 %v1728_v0 }
  0x39   :  { %1443 = vmatpush3.bf16.msra.mxu0 %v1622_v20  ;;  %v1653_v20 = vld [vmem:[#allocation2 + $0x180] sm:$0xff]  }
  0x3a   :  { %1444 = vmatprep.subr.bf16.mxu0 %v1728_v0 }
  0x3d   :  { %1445 = vmatpush3.bf16.msra.mxu0 %v1623_v21  ;;  %v1654_v21 = vld [vmem:[#allocation2 + $0x188] sm:$0xff]  }
  0x3e   :  { %1446 = vmatprep.subr.bf16.mxu0 %v1728_v0 }
  0x41   :  { %1447 = vmatpush3.bf16.msra.mxu0 %v1624_v22  ;;  %v1655_v22 = vld [vmem:[#allocation2 + $0x190] sm:$0xff]  }
  0x42   :  { %1448 = vmatprep.subr.bf16.mxu0 %v1728_v0 }
  0x45   :  { %1449 = vmatpush3.bf16.msra.mxu0 %v1625_v31 }
  0x46   :  { %1450 = vmatprep.subr.bf16.mxu0 %v1728_v0 }
  0x49   :  { %1451 = vmatpush3.bf16.msra.mxu0 %v1626_v32 }
  0x4a   :  { %1452 = vmatprep.subr.bf16.mxu0 %v1728_v0 }
  0x4d   :  { %1453 = vmatpush3.bf16.msra.mxu0 %v1627_v33  ;;  %v1657_v33 = vld [vmem:[#allocation2 + $0x1a0] sm:$0xff]  }
  0x4e   :  { %1454 = vmatprep.subr.bf16.mxu0 %v1728_v0 }
  0x51   :  { %1455 = vmatpush3.bf16.msra.mxu0 %v1628_v34  ;;  %v1658_v34 = vld [vmem:[#allocation2 + $0x1a8] sm:$0xff]  }
  0x52   :  { %1480 = vmatprep.subr.bf16.mxu0 %v1728_v0 }
 0x107   :  { %v145_v24 = vpop.f32.mrb[0].mxu0 }
 0x108   :  { %v146_v25 = vadd.f32 %v1210_v23, %v145_v24  ;;  %v1418_v26 = vpop.f32.mrb[1].mxu0  ;;  %v1656_v23 = vld [vmem:[#allocation2 + $0x198] sm:$0xff]   ;;  %v1250_v24 = vld [vmem:[%s1927_s5 + $0x4] ss:$0 sm:$0xff] }
 0x109   :  { %v148_v27 = vpop.f32.mrb[2].mxu0  ;;  %v611_v26 = vld [vmem:[%s1923_s1] sm:$0xff] }
 0x10a   :  { %1685 = vtanh.f32 %v146_v25  ;;  %v1419_v28 = vpop.f32.mrb[3].mxu0 }
 0x114   :  { %v1686_v29 = vpop.eup %1685 }
 0x115   :  { %v152_v30 = vpack.c.bf16 %v1686_v29, %v1686_v29 }
 0x117   :  { %1437 = vmatmul.mubr.bf16.vlgmr.msra.gmra.mrb[0].mxu1 %v152_v30 }
 0x118   :  { %1476 = vmatprep.mubr.msk.bf16.mxu1 %vm1729_vm0, %v1728_v0  ;;  %1461 = vmatpush3.bf16.msra.mxu1 %v1629_v35  ;;  %v1659_v35 = vld [vmem:[#allocation2 + $0x1b0] sm:$0xff]  }
 0x119   :  { %1462 = vmatprep.subr.bf16.mxu1 %v1728_v0 }
 0x11c   :  { %1463 = vmatpush3.bf16.msra.mxu1 %v1630_v36  ;;  %v1660_v36 = vld [vmem:[#allocation2 + $0x1b8] sm:$0xff]  }
 0x11d   :  { %1464 = vmatprep.subr.bf16.mxu1 %v1728_v0 }
 0x120   :  { %1465 = vmatpush3.bf16.msra.mxu1 %v1631_v37  ;;  %v1661_v37 = vld [vmem:[#allocation2 + $0x1c0] sm:$0xff]  }
 0x121   :  { %1466 = vmatprep.subr.bf16.mxu1 %v1728_v0 }
 0x124   :  { %1467 = vmatpush3.bf16.msra.mxu1 %v1632_v38  ;;  %v1662_v38 = vld [vmem:[#allocation2 + $0x1c8] sm:$0xff]  }
 0x125   :  { %1468 = vmatprep.subr.bf16.mxu1 %v1728_v0 }
 0x128   :  { %1469 = vmatpush3.bf16.msra.mxu1 %v1633_v47 }
 0x129   :  { %1470 = vmatprep.subr.bf16.mxu1 %v1728_v0 }
 0x12c   :  { %1471 = vmatpush3.bf16.msra.mxu1 %v1634_v48 }
 0x12d   :  { %1472 = vmatprep.subr.bf16.mxu1 %v1728_v0 }
 0x130   :  { %1473 = vmatpush3.bf16.msra.mxu1 %v1635_v49  ;;  %v1665_v49 = vld [vmem:[#allocation2 + $0x1e0] sm:$0xff]  }
 0x131   :  { %1474 = vmatprep.subr.bf16.mxu1 %v1728_v0 }
 0x134   :  { %1475 = vmatpush3.bf16.msra.mxu1 %v1636_v50  ;;  %v1666_v50 = vld [vmem:[#allocation2 + $0x1e8] sm:$0xff]  }
 0x135   :  { %1500 = vmatprep.subr.bf16.mxu1 %v1728_v0 }
 0x1ea   :  { %v260_v40 = vpop.f32.mrb[0].mxu1 }
 0x1eb   :  { %v261_v41 = vadd.f32 %v1220_v39, %v260_v40  ;;  %v1438_v42 = vpop.f32.mrb[1].mxu1  ;;  %v1663_v39 = vld [vmem:[#allocation2 + $0x1d0] sm:$0xff]   ;;  %v1664_v40 = vld [vmem:[#allocation2 + $0x1d8] sm:$0xff]  }
 0x1ec   :  { %v263_v43 = vpop.f32.mrb[2].mxu1 }
 0x1ed   :  { %1687 = vtanh.f32 %v261_v41  ;;  %v1439_v44 = vpop.f32.mrb[3].mxu1  ;;  %v1260_v41 = vld [vmem:[%s1927_s5 + $0x5] ss:$0 sm:$0xff] }
 0x1f7   :  { %v1688_v45 = vpop.eup %1687 }
 0x1f8   :  { %v267_v46 = vpack.c.bf16 %v1688_v45, %v1688_v45 }
 0x1fa   :  { %1457 = vmatmul.mubr.bf16.vlgmr.msra.gmra.mrb[4].mxu0 %v267_v46 }
 0x1fb   :  { %1496 = vmatprep.mubr.msk.bf16.mxu0 %vm1729_vm0, %v1728_v0  ;;  %1481 = vmatpush3.bf16.msra.mxu0 %v1637_v51  ;;  %v1667_v51 = vld [vmem:[#allocation2 + $0x1f0] sm:$0xff]  }
 0x1fc   :  { %1482 = vmatprep.subr.bf16.mxu0 %v1728_v0 }
 0x1ff   :  { %1483 = vmatpush3.bf16.msra.mxu0 %v1638_v52  ;;  %v1668_v52 = vld [vmem:[#allocation2 + $0x1f8] sm:$0xff]  }
 0x200   :  { %1484 = vmatprep.subr.bf16.mxu0 %v1728_v0 }
 0x203   :  { %1485 = vmatpush3.bf16.msra.mxu0 %v1639_v53  ;;  %v1669_v53 = vld [vmem:[#allocation2 + $0x200] sm:$0xff]  }
 0x204   :  { %1486 = vmatprep.subr.bf16.mxu0 %v1728_v0 }
 0x207   :  { %1487 = vmatpush3.bf16.msra.mxu0 %v1640_v54  ;;  %v1670_v54 = vld [vmem:[#allocation2 + $0x208] sm:$0xff]  }
 0x208   :  { %1488 = vmatprep.subr.bf16.mxu0 %v1728_v0 }
 0x20b   :  { %1489 = vmatpush3.bf16.msra.mxu0 %v1641_v63 }
 0x20c   :  { %1490 = vmatprep.subr.bf16.mxu0 %v1728_v0 }
 0x20f   :  { %1491 = vmatpush3.bf16.msra.mxu0 %v1642_v1 }
 0x210   :  { %1492 = vmatprep.subr.bf16.mxu0 %v1728_v0 }
 0x213   :  { %1493 = vmatpush3.bf16.msra.mxu0 %v1643_v2  ;;  %v1673_v2 = vld [vmem:[#allocation2 + $0x220] sm:$0xff]  }
 0x214   :  { %1494 = vmatprep.subr.bf16.mxu0 %v1728_v0 }
 0x217   :  { %1495 = vmatpush3.bf16.msra.mxu0 %v1644_v3  ;;  %v1674_v3 = vld [vmem:[#allocation2 + $0x228] sm:$0xff]  }
 0x218   :  { %1520 = vmatprep.subr.bf16.mxu0 %v1728_v0 }
 0x2cd   :  { %v375_v56 = vpop.f32.mrb[4].mxu0 }
 0x2ce   :  { %v376_v57 = vadd.f32 %v1230_v55, %v375_v56  ;;  %v1458_v58 = vpop.f32.mrb[5].mxu0  ;;  %v1671_v55 = vld [vmem:[#allocation2 + $0x210] sm:$0xff]   ;;  %v1672_v56 = vld [vmem:[#allocation2 + $0x218] sm:$0xff]  }
 0x2cf   :  { %v378_v59 = vpop.f32.mrb[6].mxu0 }
 0x2d0   :  { %1689 = vtanh.f32 %v376_v57  ;;  %v1459_v60 = vpop.f32.mrb[7].mxu0  ;;  %v1270_v57 = vld [vmem:[%s1927_s5 + $0x6] ss:$0 sm:$0xff] }
 0x2da   :  { %v1690_v61 = vpop.eup %1689 }
 0x2db   :  { %v382_v62 = vpack.c.bf16 %v1690_v61, %v1690_v61 }
 0x2dd   :  { %1477 = vmatmul.mubr.bf16.vlgmr.msra.gmra.mrb[4].mxu1 %v382_v62 }
 0x2de   :  { %1516 = vmatprep.mubr.msk.bf16.mxu1 %vm1729_vm0, %v1728_v0  ;;  %1501 = vmatpush3.bf16.msra.mxu1 %v1645_v4  ;;  %v1675_v4 = vld [vmem:[#allocation2 + $0x230] sm:$0xff]  }
 0x2df   :  { %1502 = vmatprep.subr.bf16.mxu1 %v1728_v0 }
 0x2e2   :  { %1503 = vmatpush3.bf16.msra.mxu1 %v1646_v5  ;;  %v1676_v5 = vld [vmem:[#allocation2 + $0x238] sm:$0xff]  }
 0x2e3   :  { %1504 = vmatprep.subr.bf16.mxu1 %v1728_v0 }
 0x2e6   :  { %1505 = vmatpush3.bf16.msra.mxu1 %v1647_v6  ;;  %v1677_v6 = vld [vmem:[#allocation2 + $0x240] sm:$0xff]  }
 0x2e7   :  { %1506 = vmatprep.subr.bf16.mxu1 %v1728_v0 }
 0x2ea   :  { %1507 = vmatpush3.bf16.msra.mxu1 %v1648_v7  ;;  %v1678_v7 = vld [vmem:[#allocation2 + $0x248] sm:$0xff]  }
 0x2eb   :  { %1508 = vmatprep.subr.bf16.mxu1 %v1728_v0 }
 0x2ee   :  { %1509 = vmatpush3.bf16.msra.mxu1 %v1649_v8  ;;  %v1679_v8 = vld [vmem:[#allocation2 + $0x250] sm:$0xff]  }
 0x2ef   :  { %1510 = vmatprep.subr.bf16.mxu1 %v1728_v0 }
 0x2f2   :  { %1511 = vmatpush3.bf16.msra.mxu1 %v1650_v9  ;;  %v1680_v9 = vld [vmem:[#allocation2 + $0x258] sm:$0xff]  }
 0x2f3   :  { %1512 = vmatprep.subr.bf16.mxu1 %v1728_v0 }
 0x2f6   :  { %1513 = vmatpush3.bf16.msra.mxu1 %v1651_v18  ;;  %v1681_v18 = vld [vmem:[#allocation2 + $0x260] sm:$0xff]  }
 0x2f7   :  { %1514 = vmatprep.subr.bf16.mxu1 %v1728_v0 }
 0x2fa   :  { %1515 = vmatpush3.bf16.msra.mxu1 %v1652_v19  ;;  %v1682_v19 = vld [vmem:[#allocation2 + $0x268] sm:$0xff]  }
 0x2fb   :  { %1540 = vmatprep.subr.bf16.mxu1 %v1728_v0 }
 0x3b0   :  { %v490_v11 = vpop.f32.mrb[4].mxu1 }
 0x3b1   :  { %v491_v12 = vadd.f32 %v1240_v10, %v490_v11  ;;  %v1478_v13 = vpop.f32.mrb[5].mxu1  ;;  %v1280_v10 = vld [vmem:[%s1927_s5 + $0x7] ss:$0 sm:$0xff] }
 0x3b2   :  { %v493_v14 = vpop.f32.mrb[6].mxu1 }
 0x3b3   :  { %1691 = vtanh.f32 %v491_v12  ;;  %v1479_v15 = vpop.f32.mrb[7].mxu1 }
 0x3bd   :  { %v1692_v16 = vpop.eup %1691 }
 0x3be   :  { %v497_v17 = vpack.c.bf16 %v1692_v16, %v1692_v16 }
 0x3c0   :  { %1497 = vmatmul.mubr.bf16.vlgmr.msra.gmra.mrb[8].mxu0 %v497_v17 }
 0x3c1   :  { %1536 = vmatprep.mubr.msk.bf16.mxu0 %vm1729_vm0, %v1728_v0  ;;  %1521 = vmatpush3.bf16.msra.mxu0 %v1653_v20  ;;  %v1683_v20 = vld [vmem:[#allocation2 + $0x270] sm:$0xff]  }
 0x3c2   :  { %1522 = vmatprep.subr.bf16.mxu0 %v1728_v0 }
 0x3c5   :  { %1523 = vmatpush3.bf16.msra.mxu0 %v1654_v21  ;;  %v1684_v21 = vld [vmem:[#allocation2 + $0x278] sm:$0xff]  }
 0x3c6   :  { %1524 = vmatprep.subr.bf16.mxu0 %v1728_v0 }
 0x3c9   :  { %1525 = vmatpush3.bf16.msra.mxu0 %v1655_v22  ;;  %v1290_v22 = vld [vmem:[%s1927_s5 + $0x8] ss:$0 sm:$0xff] }
 0x3ca   :  { %1526 = vmatprep.subr.bf16.mxu0 %v1728_v0 }
 0x3cd   :  { %1527 = vmatpush3.bf16.msra.mxu0 %v1656_v23 }
 0x3ce   :  { %1528 = vmatprep.subr.bf16.mxu0 %v1728_v0 }
 0x3d1   :  { %1529 = vmatpush3.bf16.msra.mxu0 %v1657_v33 }
 0x3d2   :  { %1530 = vmatprep.subr.bf16.mxu0 %v1728_v0 }
 0x3d5   :  { %1531 = vmatpush3.bf16.msra.mxu0 %v1658_v34 }
 0x3d6   :  { %1532 = vmatprep.subr.bf16.mxu0 %v1728_v0 }
 0x3d9   :  { %1533 = vmatpush3.bf16.msra.mxu0 %v1659_v35 }
 0x3da   :  { %1534 = vmatprep.subr.bf16.mxu0 %v1728_v0 }
 0x3dd   :  { %1535 = vmatpush3.bf16.msra.mxu0 %v1660_v36 }
 0x3de   :  { %1560 = vmatprep.subr.bf16.mxu0 %v1728_v0 }
 0x493   :  { %v605_v25 = vpop.f32.mrb[8].mxu0 }
 0x494   :  { %v606_v27 = vadd.f32 %v1250_v24, %v605_v25  ;;  %v1498_v28 = vpop.f32.mrb[9].mxu0 }
 0x495   :  { %v608_v29 = vpop.f32.mrb[10].mxu0 }
 0x496   :  { %v612_v30 = vadd.f32 %v611_v26, %v606_v27  ;;  %v1499_v31 = vpop.f32.mrb[11].mxu0 }
 0x497   :  { %v1187_v31 = vld [vmem:[%s1924_s2] sm:$0xff] }
 0x498   :  { %v613_v32 = vpack.c.bf16 %v612_v30, %v612_v30  ;;  %v1300_v30 = vld [vmem:[%s1927_s5 + $0x9] ss:$0 sm:$0xff] }
 0x49a   :  { %1517 = vmatmul.mubr.bf16.vlgmr.msra.gmra.mrb[8].mxu1 %v613_v32 }
 0x49b   :  { %1556 = vmatprep.mubr.msk.bf16.mxu1 %vm1729_vm0, %v1728_v0  ;;  %1541 = vmatpush3.bf16.msra.mxu1 %v1661_v37  ;;  %v1309_v37 = vld [vmem:[%s1925_s3] ss:$0 sm:$0xff] }
 0x49c   :  { %1542 = vmatprep.subr.bf16.mxu1 %v1728_v0 }
 0x49f   :  { %1543 = vmatpush3.bf16.msra.mxu1 %v1662_v38 }
 0x4a0   :  { %1544 = vmatprep.subr.bf16.mxu1 %v1728_v0 }
 0x4a3   :  { %1545 = vmatpush3.bf16.msra.mxu1 %v1663_v39 }
 0x4a4   :  { %1546 = vmatprep.subr.bf16.mxu1 %v1728_v0 }
 0x4a7   :  { %1547 = vmatpush3.bf16.msra.mxu1 %v1664_v40 }
 0x4a8   :  { %1548 = vmatprep.subr.bf16.mxu1 %v1728_v0 }
 0x4ab   :  { %1549 = vmatpush3.bf16.msra.mxu1 %v1665_v49 }
 0x4ac   :  { %1550 = vmatprep.subr.bf16.mxu1 %v1728_v0 }
 0x4af   :  { %1551 = vmatpush3.bf16.msra.mxu1 %v1666_v50 }
 0x4b0   :  { %1552 = vmatprep.subr.bf16.mxu1 %v1728_v0 }
 0x4b3   :  { %1553 = vmatpush3.bf16.msra.mxu1 %v1667_v51 }
 0x4b4   :  { %1554 = vmatprep.subr.bf16.mxu1 %v1728_v0 }
 0x4b7   :  { %1555 = vmatpush3.bf16.msra.mxu1 %v1668_v52 }
 0x4b8   :  { %1580 = vmatprep.subr.bf16.mxu1 %v1728_v0 }
 0x56d   :  { %v721_v42 = vpop.f32.mrb[8].mxu1 }
 0x56e   :  { %v722_v43 = vadd.f32 %v1260_v41, %v721_v42  ;;  %v1518_v44 = vpop.f32.mrb[9].mxu1 }
 0x56f   :  { %v724_v45 = vpop.f32.mrb[10].mxu1 }
 0x570   :  { %1693 = vtanh.f32 %v722_v43  ;;  %v1519_v46 = vpop.f32.mrb[11].mxu1 }
 0x57a   :  { %v1694_v47 = vpop.eup %1693 }
 0x57b   :  { %v728_v48 = vpack.c.bf16 %v1694_v47, %v1694_v47 }
 0x57d   :  { %1537 = vmatmul.mubr.bf16.vlgmr.msra.gmra.mrb[12].mxu0 %v728_v48 }
 0x57e   :  { %1576 = vmatprep.mubr.msk.bf16.mxu0 %vm1729_vm0, %v1728_v0  ;;  %1561 = vmatpush3.bf16.msra.mxu0 %v1669_v53 }
 0x57f   :  { %1562 = vmatprep.subr.bf16.mxu0 %v1728_v0 }
 0x582   :  { %1563 = vmatpush3.bf16.msra.mxu0 %v1670_v54 }
 0x583   :  { %1564 = vmatprep.subr.bf16.mxu0 %v1728_v0 }
 0x586   :  { %1565 = vmatpush3.bf16.msra.mxu0 %v1671_v55 }
 0x587   :  { %1566 = vmatprep.subr.bf16.mxu0 %v1728_v0 }
 0x58a   :  { %1567 = vmatpush3.bf16.msra.mxu0 %v1672_v56 }
 0x58b   :  { %1568 = vmatprep.subr.bf16.mxu0 %v1728_v0 }
 0x58e   :  { %1569 = vmatpush3.bf16.msra.mxu0 %v1673_v2 }
 0x58f   :  { %1570 = vmatprep.subr.bf16.mxu0 %v1728_v0 }
 0x592   :  { %1571 = vmatpush3.bf16.msra.mxu0 %v1674_v3 }
 0x593   :  { %1572 = vmatprep.subr.bf16.mxu0 %v1728_v0 }
 0x596   :  { %1573 = vmatpush3.bf16.msra.mxu0 %v1675_v4 }
 0x597   :  { %1574 = vmatprep.subr.bf16.mxu0 %v1728_v0 }
 0x59a   :  { %1575 = vmatpush3.bf16.msra.mxu0 %v1676_v5 }
 0x650   :  { %v836_v58 = vpop.f32.mrb[12].mxu0 }
 0x651   :  { %v837_v59 = vadd.f32 %v1270_v57, %v836_v58  ;;  %v1538_v60 = vpop.f32.mrb[13].mxu0 }
 0x652   :  { %v839_v61 = vpop.f32.mrb[14].mxu0 }
 0x653   :  { %1695 = vtanh.f32 %v837_v59  ;;  %v1539_v62 = vpop.f32.mrb[15].mxu0 }
 0x65d   :  { %v1696_v63 = vpop.eup %1695 }
 0x65e   :  { %v843_v1 = vpack.c.bf16 %v1696_v63, %v1696_v63 }
 0x660   :  { %1557 = vmatmul.mubr.bf16.vlgmr.msra.gmra.mrb[12].mxu1 %v843_v1 }
 0x661   :  { %1596 = vmatprep.mubr.msk.bf16.mxu1 %vm1729_vm0, %v1728_v0  ;;  %1581 = vmatpush3.bf16.msra.mxu1 %v1677_v6 }
 0x662   :  { %1582 = vmatprep.subr.bf16.mxu1 %v1728_v0 }
 0x665   :  { %1583 = vmatpush3.bf16.msra.mxu1 %v1678_v7 }
 0x666   :  { %1584 = vmatprep.subr.bf16.mxu1 %v1728_v0 }
 0x669   :  { %1585 = vmatpush3.bf16.msra.mxu1 %v1679_v8 }
 0x66a   :  { %1586 = vmatprep.subr.bf16.mxu1 %v1728_v0 }
 0x66d   :  { %1587 = vmatpush3.bf16.msra.mxu1 %v1680_v9 }
 0x66e   :  { %1588 = vmatprep.subr.bf16.mxu1 %v1728_v0 }
 0x671   :  { %1589 = vmatpush3.bf16.msra.mxu1 %v1681_v18 }
 0x672   :  { %1590 = vmatprep.subr.bf16.mxu1 %v1728_v0 }
 0x675   :  { %1591 = vmatpush3.bf16.msra.mxu1 %v1682_v19 }
 0x676   :  { %1592 = vmatprep.subr.bf16.mxu1 %v1728_v0 }
 0x679   :  { %1593 = vmatpush3.bf16.msra.mxu1 %v1683_v20 }
 0x67a   :  { %1594 = vmatprep.subr.bf16.mxu1 %v1728_v0 }
 0x67d   :  { %1595 = vmatpush3.bf16.msra.mxu1 %v1684_v21 }
 0x733   :  { %v951_v11 = vpop.f32.mrb[12].mxu1 }
 0x734   :  { %v952_v12 = vadd.f32 %v1280_v10, %v951_v11  ;;  %v1558_v13 = vpop.f32.mrb[13].mxu1 }
 0x735   :  { %v954_v14 = vpop.f32.mrb[14].mxu1 }
 0x736   :  { %1697 = vtanh.f32 %v952_v12  ;;  %v1559_v15 = vpop.f32.mrb[15].mxu1 }
 0x740   :  { %v1698_v16 = vpop.eup %1697 }
 0x741   :  { %v958_v17 = vpack.c.bf16 %v1698_v16, %v1698_v16 }
 0x743   :  { %1577 = vmatmul.mubr.bf16.vlgmr.msra.gmra.mrb[16].mxu0 %v958_v17 }
 0x816   :  { %v1066_v23 = vpop.f32.mrb[16].mxu0 }
 0x817   :  { %v1067_v24 = vadd.f32 %v1290_v22, %v1066_v23  ;;  %v1578_v25 = vpop.f32.mrb[17].mxu0 }
 0x818   :  { %v1069_v26 = vpop.f32.mrb[18].mxu0 }
 0x819   :  { %1699 = vtanh.f32 %v1067_v24  ;;  %v1579_v27 = vpop.f32.mrb[19].mxu0 }
 0x823   :  { %v1700_v28 = vpop.eup %1699 }
 0x824   :  { %v1073_v29 = vpack.c.bf16 %v1700_v28, %v1700_v28 }
 0x826   :  { %1597 = vmatmul.mubr.bf16.vlgmr.msra.gmra.mrb[16].mxu1 %v1073_v29 }
 0x8f9   :  { %v1181_v0 = vpop.f32.mrb[16].mxu1 }
 0x8fa   :  { %v1182_v32 = vadd.f32 %v1300_v30, %v1181_v0  ;;  %v1598_v33 = vpop.f32.mrb[17].mxu1 }
 0x8fb   :  { %v1184_v34 = vpop.f32.mrb[18].mxu1 }
 0x8fc   :  { %v1188_v35 = vsub.f32 %v1182_v32, %v1187_v31  ;;  %v1599_v36 = vpop.f32.mrb[19].mxu1 }
 0x8fe   :  { %v1189_v38 = vmul.f32 %v1188_v35, %v1188_v35 }
 0x900   :  { %v1197_v39 = vmul.f32 %v1309_v37, %v1189_v38 }
 0x902   :  { %v1198_v40 = vrot.slane %v1197_v39, 4 }
 0x904   :  { %v1199_v41 = vadd.f32 %v1198_v40, %v1197_v39 }
 0x906   :  { %v1200_v42 = vrot.slane %v1199_v41, 2 }
 0x908   :  { %v1201_v43 = vadd.f32 %v1200_v42, %v1199_v41 }
 0x90a   :  { %v1202_v44 = vrot.slane %v1201_v43, 1 }
 0x90c   :  { %v1203_v45 = vadd.f32 %v1202_v44, %v1201_v43 }
 0x90e   :  { %1204 = vst [vmem:[%s1928_s6] sm:$0x1] %v1203_v45 }
 0x90f   :  { %1209 = vsyncpa [#allocation3], 1 }

</bundles_post_ra>
